<compile_context>
chip_gen: v5e
topology: v5e:2x2
jax: 0.10.0
libtpu: 0.0.40
codegen_flags: <defaults>
</compile_context>

<pallas_src>
import math
import functools

import jax
import jax.numpy as jnp
import numpy as np
from jax.experimental import pallas as pl
from jax.experimental.pallas import tpu as pltpu

# Model hyper-parameters (d = 2*k so that flip=True is well-defined).
D = 4
K = 2
HIDDEN = 32
NEG_SLOPE = 0.01                  # torch.nn.LeakyReLU default negative_slope
DEFAULT_BLOCK_N = 16384           # lane columns per grid step (sweep 8K-32K)
MIN_GRID_STEPS = 4                # keep both v7x TensorCores busy
VMEM_LIMIT_BYTES = 32 * 1024 * 1024


def _round_up(x, m):
    return (x + m - 1) // m * m


def _rnvp_fwd_kernel(x_ref, w1_ref, b1_ref, w2_ref, b2_ref,
                     mu_ref, covinv_ref, out_ref,
                     *, flip, k, d, logdet_cov, identity_cov):
    dk = d - k
    xt = x_ref[...]                                   # (d, NB)
    if flip:                                          # trace-time flag
        x1 = xt[k:, :]                                # conditioning half
        x2 = xt[:k, :]                                # transformed half
    else:
        x1 = xt[:k, :]
        x2 = xt[k:, :]

    # ---- layer 1 (packed sig|mu) on the MXU --------------------------------
    # Contraction depth k(=2) wastes MXU utilization, but the MXU is idle
    # slack while VALU was the saturating slot; HIGHEST keeps f32 parity.
    h = jnp.dot(w1_ref[...], x1, preferred_element_type=jnp.float32,
                precision=jax.lax.Precision.HIGHEST) + b1_ref[...]
    h = jnp.maximum(h, NEG_SLOPE * h)                 # LeakyReLU: mul + max

    # ---- layer 2: block-diagonal matmul -> [sig; mu] ------------------------
    out = jnp.dot(w2_ref[...], h, preferred_element_type=jnp.float32,
                  precision=jax.lax.Precision.HIGHEST) + b2_ref[...]
    sig = out[:dk, :]                                 # (dk, NB)
    mu = out[dk:, :]                                  # (dk, NB)

    z2 = x2 * jnp.exp(sig) + mu                       # (dk, NB)

    # z_hat assembled in vregs (sublane concat) and reused for the log-prob.
    if flip:
        zh = jnp.concatenate([z2, x1], axis=0)        # (d, NB)
    else:
        zh = jnp.concatenate([x1, z2], axis=0)

    # ---- multivariate-normal log-prob ---------------------------------------
    diff = zh - mu_ref[...]                           # broadcast (d, 1)
    if identity_cov:
        quad = jnp.sum(diff * diff, axis=0, keepdims=True)               # (1, NB)
    else:
        quad = jnp.sum(
            diff * jnp.dot(covinv_ref[...], diff,
                           preferred_element_type=jnp.float32,
                           precision=jax.lax.Precision.HIGHEST),
            axis=0, keepdims=True)                                        # (1, NB)

    const = -0.5 * logdet_cov - 0.5 * d * math.log(2.0 * math.pi)
    log_pz = -0.5 * quad + const                      # (1, NB)
    log_jacob = jnp.sum(sig, axis=0, keepdims=True)   # (1, NB)

    # Single unmasked full-sublane store of the packed output slab.
    nb = zh.shape[1]
    pad_rows = out_ref.shape[0] - (d + 2)
    pieces = [zh, log_pz, log_jacob]
    if pad_rows:
        pieces.append(jnp.zeros((pad_rows, nb), jnp.float32))
    out_ref[...] = jnp.concatenate(pieces, axis=0)


def init_params(key, d=D, k=K, hidden=HIDDEN):
    """Deterministic synthetic parameters (weights stored as (in, out))."""
    ks = jax.random.split(key, 8)
    scale = 0.1
    return {
        "w1s": scale * jax.random.normal(ks[0], (k, hidden), jnp.float32),
        "b1s": scale * jax.random.normal(ks[1], (1, hidden), jnp.float32),
        "w2s": scale * jax.random.normal(ks[2], (hidden, d - k), jnp.float32),
        "b2s": scale * jax.random.normal(ks[3], (1, d - k), jnp.float32),
        "w1m": scale * jax.random.normal(ks[4], (k, hidden), jnp.float32),
        "b1m": scale * jax.random.normal(ks[5], (1, hidden), jnp.float32),
        "w2m": scale * jax.random.normal(ks[6], (hidden, d - k), jnp.float32),
        "b2m": scale * jax.random.normal(ks[7], (1, d - k), jnp.float32),
    }


def rnvp_forward(x, params, base_mu, base_cov, *, flip=False,
                 block_n=DEFAULT_BLOCK_N):
    n, d = x.shape
    k = K
    dk = d - k
    hidden = params["w1s"].shape[1]

    # ---- host-side parameter packing (fused sig|mu nets) --------------------
    w1p = jnp.concatenate([params["w1s"].T, params["w1m"].T], axis=0)    # (2H, k)
    b1p = jnp.concatenate([params["b1s"], params["b1m"]], axis=1).T      # (2H, 1)
    w2bd = jnp.zeros((2 * dk, 2 * hidden), jnp.float32)
    w2bd = w2bd.at[:dk, :hidden].set(params["w2s"].T)
    w2bd = w2bd.at[dk:, hidden:].set(params["w2m"].T)                    # block-diag
    b2p = jnp.concatenate([params["b2s"], params["b2m"]], axis=1).T      # (2dk, 1)

    # Base-distribution constants (concrete at trace time, like the original).
    # TODO(synk): if base_cov ever becomes a traced array, move inv/slogdet into JAX.
    base_cov64 = np.asarray(base_cov, np.float64)
    cov_inv = jnp.asarray(np.linalg.inv(base_cov64), jnp.float32)        # (d, d)
    logdet_cov = float(np.linalg.slogdet(base_cov64)[1])
    identity_cov = bool(np.array_equal(base_cov64, np.eye(d)))           # exact only
    base_mu_col = jnp.asarray(base_mu, jnp.float32).reshape(d, 1)

    # ---- one fused pad + transpose; flip / split handled in-kernel ----------
    if n >= MIN_GRID_STEPS * 128:
        blk = min(block_n, _round_up(-(-n // MIN_GRID_STEPS), 128))
    else:
        blk = _round_up(max(n, 1), 128)
    n_pad = _round_up(n, blk)
    pad = n_pad - n
    xp = jnp.pad(x, ((0, pad), (0, 0))) if pad else x
    xt = xp.T                                                            # (d, n_pad)

    grid = (n_pad // blk,)
    out_rows = _round_up(d + 2, 8)

    def batch_spec(rows):            # tiled along the batch/lane axis
        return pl.BlockSpec((rows, blk), lambda i: (0, i))

    def const_spec(shape):           # resident in VMEM across grid steps
        return pl.BlockSpec(shape, lambda i: (0, 0))

    kernel = functools.partial(
        _rnvp_fwd_kernel, flip=flip, k=k, d=d,
        logdet_cov=logdet_cov, identity_cov=identity_cov)

    out = pl.pallas_call(
        kernel,
        out_shape=jax.ShapeDtypeStruct((out_rows, n_pad), jnp.float32),
        grid=grid,
        in_specs=[
            batch_spec(d),                      # x^T (single input slab)
            const_spec((2 * hidden, k)),        # packed layer-1 weights
            const_spec((2 * hidden, 1)),        # packed layer-1 bias
            const_spec((2 * dk, 2 * hidden)),   # block-diag layer-2 weights
            const_spec((2 * dk, 1)),            # packed layer-2 bias
            const_spec((d, 1)),                 # base_mu
            const_spec((d, d)),                 # cov^{-1}
        ],
        out_specs=batch_spec(out_rows),
        compiler_params=pltpu.CompilerParams(
            dimension_semantics=("parallel",),
            vmem_limit_bytes=VMEM_LIMIT_BYTES),
    )(xt, w1p, b1p, w2bd, b2p, base_mu_col, cov_inv)

    # TODO(synk): in a stacked RealNVP the next coupling layer should consume
    # the (d, N) batch-on-lanes layout directly and skip this transpose.
    z_hat = out[:d, :n].T
    log_pz = out[d, :n]
    log_jacob = out[d + 1, :n]
    return z_hat, log_pz, log_jacob


def rnvp_forward_ref(x, params, base_mu, base_cov, *, flip=False):
    """float64 NumPy reference mirroring the PyTorch forward()."""
    k = K
    d = x.shape[-1]
    xn = np.asarray(x, np.float64)
    p = {name: np.asarray(v, np.float64) for name, v in params.items()}
    x1, x2 = xn[:, :k], xn[:, k:]
    if flip:
        x1, x2 = x2, x1

    def mlp(w1, b1, w2, b2):
        h = x1 @ w1 + b1
        h = np.where(h > 0, h, NEG_SLOPE * h)
        return h @ w2 + b2

    sig = mlp(p["w1s"], p["b1s"], p["w2s"], p["b2s"])
    mu = mlp(p["w1m"], p["b1m"], p["w2m"], p["b2m"])
    z1, z2 = x1, x2 * np.exp(sig) + mu
    if flip:
        z1, z2 = z2, z1
    z_hat = np.concatenate([z1, z2], axis=-1)

    cov64 = np.asarray(base_cov, np.float64)
    cov_inv = np.linalg.inv(cov64)
    logdet = np.linalg.slogdet(cov64)[1]
    diff = z_hat - np.asarray(base_mu, np.float64)[None, :]
    quad = np.sum(diff * (diff @ cov_inv), axis=-1)
    log_pz = -0.5 * quad - 0.5 * logdet - 0.5 * d * math.log(2.0 * math.pi)
    log_jacob = sig.sum(-1)
    return z_hat, log_pz, log_jacob


if __name__ == "__main__":
    key = jax.random.PRNGKey(0)
    pkey, xkey, x2key = jax.random.split(key, 3)

    params = init_params(pkey)

    def check(xin, bmu, bcov, flip):
        z_hat, log_pz, log_jacob = rnvp_forward(xin, params, bmu, bcov, flip=flip)
        jax.block_until_ready((z_hat, log_pz, log_jacob))
        z_ref, pz_ref, lj_ref = rnvp_forward_ref(xin, params, bmu, bcov, flip=flip)
        np.testing.assert_allclose(np.asarray(z_hat), z_ref, rtol=1e-4, atol=1e-4)
        np.testing.assert_allclose(np.asarray(log_pz), pz_ref, rtol=1e-4, atol=1e-4)
        np.testing.assert_allclose(np.asarray(log_jacob), lj_ref, rtol=1e-4, atol=1e-4)

    # Small batch, standard-normal base distribution (identity-cov fast path).
    N = 8
    x_small = jax.random.normal(xkey, (N, D), jnp.float32)
    base_mu = np.zeros((D,), np.float32)
    base_cov = np.eye(D, dtype=np.float32)
    for flip in (False, True):
        check(x_small, base_mu, base_cov, flip)

    # Larger batch (multi-step "parallel" grid) with a non-identity covariance
    # to exercise the general log-prob path and the pipelined grid.
    N2 = 1000
    x_large = jax.random.normal(x2key, (N2, D), jnp.float32)
    a = 0.1 * np.asarray(jax.random.normal(jax.random.PRNGKey(7), (D, D),
                                           jnp.float32), np.float64)
    base_cov2 = (a @ a.T + np.eye(D)).astype(np.float32)
    base_mu2 = (np.arange(D) * 0.1).astype(np.float32)
    for flip in (False, True):
        check(x_large, base_mu2, base_cov2, flip)

    print("KERNEL_OK")
</pallas_src>

<mosaic_0001>
module attributes {stable_mosaic.version = 11 : i64} {
  func.func @_rnvp_fwd_kernel(%arg0: i32, %arg1: memref<4x128xf32, #tpu.memory_space<vmem>>, %arg2: memref<64x2xf32, #tpu.memory_space<vmem>>, %arg3: memref<64x1xf32, #tpu.memory_space<vmem>>, %arg4: memref<4x64xf32, #tpu.memory_space<vmem>>, %arg5: memref<4x1xf32, #tpu.memory_space<vmem>>, %arg6: memref<4x1xf32, #tpu.memory_space<vmem>>, %arg7: memref<4x4xf32, #tpu.memory_space<vmem>>, %arg8: memref<8x128xf32, #tpu.memory_space<vmem>>) attributes {dimension_semantics = [#tpu.dimension_semantics<parallel>], iteration_bounds = array<i64: 1>, scalar_prefetch = 0 : i64, scratch_operands = 0 : i64, tpu.core_type = #tpu.core_type<tc>, window_params = [{transform_indices = @transform_0, window_bounds = array<i64: 4, 128>}, {pipeline_mode = #tpu.pipeline_mode<synchronous>, transform_indices = @transform_1, window_bounds = array<i64: 64, 2>}, {pipeline_mode = #tpu.pipeline_mode<synchronous>, transform_indices = @transform_2, window_bounds = array<i64: 64, 1>}, {pipeline_mode = #tpu.pipeline_mode<synchronous>, transform_indices = @transform_3, window_bounds = array<i64: 4, 64>}, {pipeline_mode = #tpu.pipeline_mode<synchronous>, transform_indices = @transform_4, window_bounds = array<i64: 4, 1>}, {pipeline_mode = #tpu.pipeline_mode<synchronous>, transform_indices = @transform_5, window_bounds = array<i64: 4, 1>}, {pipeline_mode = #tpu.pipeline_mode<synchronous>, transform_indices = @transform_6, window_bounds = array<i64: 4, 4>}, {transform_indices = @transform_7, window_bounds = array<i64: 8, 128>}]} {
    %c0 = arith.constant 0 : index
    %c0_0 = arith.constant 0 : index
    %0 = vector.load %arg1[%c0, %c0_0] : memref<4x128xf32, #tpu.memory_space<vmem>>, vector<4x128xf32>
    %1 = vector.extract_strided_slice %0 {offsets = [0, 0], sizes = [2, 128], strides = [1, 1]} : vector<4x128xf32> to vector<2x128xf32>
    %2 = vector.extract_strided_slice %0 {offsets = [2, 0], sizes = [2, 128], strides = [1, 1]} : vector<4x128xf32> to vector<2x128xf32>
    %c0_1 = arith.constant 0 : index
    %c0_2 = arith.constant 0 : index
    %3 = vector.load %arg2[%c0_1, %c0_2] : memref<64x2xf32, #tpu.memory_space<vmem>>, vector<64x2xf32>
    %cst = arith.constant dense<0.000000e+00> : vector<64x128xf32>
    %4 = tpu.matmul %3, %1, %cst {dimension_numbers = #tpu.dot_dimension_numbers<[1], [0], [0], [1], [0, 0, 1, 1], [], []>, precision = #tpu.contract_precision<fp32>} : vector<64x2xf32>, vector<2x128xf32>, vector<64x128xf32> -> vector<64x128xf32>
    %c0_3 = arith.constant 0 : index
    %c0_4 = arith.constant 0 : index
    %5 = vector.load %arg3[%c0_3, %c0_4] : memref<64x1xf32, #tpu.memory_space<vmem>>, vector<64x1xf32>
    %6 = vector.broadcast %5 : vector<64x1xf32> to vector<64x128xf32>
    %7 = arith.addf %4, %6 : vector<64x128xf32>
    %cst_5 = arith.constant 0.00999999977 : f32
    %8 = vector.broadcast %cst_5 : f32 to vector<64x128xf32>
    %9 = arith.mulf %8, %7 : vector<64x128xf32>
    %10 = arith.maximumf %7, %9 : vector<64x128xf32>
    %c0_6 = arith.constant 0 : index
    %c0_7 = arith.constant 0 : index
    %11 = vector.load %arg4[%c0_6, %c0_7] : memref<4x64xf32, #tpu.memory_space<vmem>>, vector<4x64xf32>
    %cst_8 = arith.constant dense<0.000000e+00> : vector<4x128xf32>
    %12 = tpu.matmul %11, %10, %cst_8 {dimension_numbers = #tpu.dot_dimension_numbers<[1], [0], [0], [1], [0, 0, 1, 1], [], []>, precision = #tpu.contract_precision<fp32>} : vector<4x64xf32>, vector<64x128xf32>, vector<4x128xf32> -> vector<4x128xf32>
    %c0_9 = arith.constant 0 : index
    %c0_10 = arith.constant 0 : index
    %13 = vector.load %arg5[%c0_9, %c0_10] : memref<4x1xf32, #tpu.memory_space<vmem>>, vector<4x1xf32>
    %14 = vector.broadcast %13 : vector<4x1xf32> to vector<4x128xf32>
    %15 = arith.addf %12, %14 : vector<4x128xf32>
    %16 = vector.extract_strided_slice %15 {offsets = [0, 0], sizes = [2, 128], strides = [1, 1]} : vector<4x128xf32> to vector<2x128xf32>
    %17 = vector.extract_strided_slice %15 {offsets = [2, 0], sizes = [2, 128], strides = [1, 1]} : vector<4x128xf32> to vector<2x128xf32>
    %18 = math.exp %16 : vector<2x128xf32>
    %19 = arith.mulf %2, %18 : vector<2x128xf32>
    %20 = arith.addf %19, %17 : vector<2x128xf32>
    %21 = tpu.concatenate %1, %20 in 0 : vector<2x128xf32>, vector<2x128xf32> -> vector<4x128xf32>
    %c0_11 = arith.constant 0 : index
    %c0_12 = arith.constant 0 : index
    %22 = vector.load %arg6[%c0_11, %c0_12] : memref<4x1xf32, #tpu.memory_space<vmem>>, vector<4x1xf32>
    %23 = vector.broadcast %22 : vector<4x1xf32> to vector<4x128xf32>
    %24 = arith.subf %21, %23 : vector<4x128xf32>
    %25 = arith.mulf %24, %24 : vector<4x128xf32>
    %cst_13 = arith.constant dense<0.000000e+00> : vector<128xf32>
    %26 = vector.multi_reduction <add>, %25, %cst_13 [0] : vector<4x128xf32> to vector<128xf32>
    %27 = vector.shape_cast %26 : vector<128xf32> to vector<1x128xf32>
    %cst_14 = arith.constant -5.000000e-01 : f32
    %28 = vector.broadcast %cst_14 : f32 to vector<1x128xf32>
    %29 = arith.mulf %28, %27 : vector<1x128xf32>
    %cst_15 = arith.constant -3.67575407 : f32
    %30 = vector.broadcast %cst_15 : f32 to vector<1x128xf32>
    %31 = arith.addf %29, %30 : vector<1x128xf32>
    %cst_16 = arith.constant dense<0.000000e+00> : vector<128xf32>
    %32 = vector.multi_reduction <add>, %16, %cst_16 [0] : vector<2x128xf32> to vector<128xf32>
    %33 = vector.shape_cast %32 : vector<128xf32> to vector<1x128xf32>
    %cst_17 = arith.constant 0.000000e+00 : f32
    %34 = vector.broadcast %cst_17 : f32 to vector<2x128xf32>
    %35 = tpu.concatenate %21, %31, %33, %34 in 0 : vector<4x128xf32>, vector<1x128xf32>, vector<1x128xf32>, vector<2x128xf32> -> vector<8x128xf32>
    %c0_18 = arith.constant 0 : index
    %c0_19 = arith.constant 0 : index
    %36 = vector.load %arg8[%c0_18, %c0_19] : memref<8x128xf32, #tpu.memory_space<vmem>>, vector<8x128xf32>
    tpu.vector_store %arg8[%c0_18, %c0_19], %35 {strides = array<i32>} : memref<8x128xf32, #tpu.memory_space<vmem>>, vector<8x128xf32>,
    return
  }
  func.func @transform_0(%arg0: i32) -> (i32, i32) {
    %c0_i32 = arith.constant 0 : i32
    %c0_i32_0 = arith.constant 0 : i32
    return %c0_i32, %arg0 : i32, i32
  }
  func.func @transform_1(%arg0: i32) -> (i32, i32) {
    %c0_i32 = arith.constant 0 : i32
    %c0_i32_0 = arith.constant 0 : i32
    %c0_i32_1 = arith.constant 0 : i32
    return %c0_i32, %c0_i32_0 : i32, i32
  }
  func.func @transform_2(%arg0: i32) -> (i32, i32) {
    %c0_i32 = arith.constant 0 : i32
    %c0_i32_0 = arith.constant 0 : i32
    %c0_i32_1 = arith.constant 0 : i32
    return %c0_i32, %c0_i32_0 : i32, i32
  }
  func.func @transform_3(%arg0: i32) -> (i32, i32) {
    %c0_i32 = arith.constant 0 : i32
    %c0_i32_0 = arith.constant 0 : i32
    %c0_i32_1 = arith.constant 0 : i32
    return %c0_i32, %c0_i32_0 : i32, i32
  }
  func.func @transform_4(%arg0: i32) -> (i32, i32) {
    %c0_i32 = arith.constant 0 : i32
    %c0_i32_0 = arith.constant 0 : i32
    %c0_i32_1 = arith.constant 0 : i32
    return %c0_i32, %c0_i32_0 : i32, i32
  }
  func.func @transform_5(%arg0: i32) -> (i32, i32) {
    %c0_i32 = arith.constant 0 : i32
    %c0_i32_0 = arith.constant 0 : i32
    %c0_i32_1 = arith.constant 0 : i32
    return %c0_i32, %c0_i32_0 : i32, i32
  }
  func.func @transform_6(%arg0: i32) -> (i32, i32) {
    %c0_i32 = arith.constant 0 : i32
    %c0_i32_0 = arith.constant 0 : i32
    %c0_i32_1 = arith.constant 0 : i32
    return %c0_i32, %c0_i32_0 : i32, i32
  }
  func.func @transform_7(%arg0: i32) -> (i32, i32) {
    %c0_i32 = arith.constant 0 : i32
    %c0_i32_0 = arith.constant 0 : i32
    return %c0_i32, %arg0 : i32, i32
  }
}

</mosaic_0001>

<bundles_post_ra>
// kernel: tpu_custom_call.1
= control target key start
LH: loop header
LB: loop body
LE: loop exit
PB: predicated region body
PF: predicated region fallthrough
CT: control target
= control target key end

     0   :  { %vm109_vm0 = vcmask 1041408   ;;  %v830_v3 = vmov 0   ;;  %vm84_vm1 = vcmask 15360   ;;  %s1107_s0 = inlined_call_operand.vmem [shape: f32[4,128], index: 0, kind: input, shape index: {}]   ;;  %s1108_s1 = inlined_call_operand.vmem [shape: f32[64,2], index: 1, kind: input, shape index: {}]   ;;  %s1109_s2 = inlined_call_operand.vmem [shape: f32[64,1], index: 2, kind: input, shape index: {}]   ;;  %s1110_s3 = inlined_call_operand.vmem [shape: f32[4,64], index: 3, kind: input, shape index: {}]   ;;  %s1111_s4 = inlined_call_operand.vmem [shape: f32[4,1], index: 4, kind: input, shape index: {}]   ;;  %s1112_s5 = inlined_call_operand.vmem [shape: f32[4,1], index: 5, kind: input, shape index: {}]   ;;  %s1113_s6 = inlined_call_operand.vmem [shape: f32[4,4], index: 6, kind: input, shape index: {}]   ;;  %s1114_s7 = inlined_call_operand.hbm [shape: f32[8,128], index: 7, kind: output, shape index: {}]  }
   0x1   :  { %v41_v0 = vld [vmem:[%s1109_s2 + $0x28] sm:$0xff]  ;;  %v878_v1 = vld [vmem:[%s1107_s0] sm:$0xf]  ;;  %800 = vset.pattern.permute.xlu1 %v830_v3  ;;  %v35_v5 = vld [vmem:[%s1108_s1 + $0x38] sm:$0xff]  ;;  %799 = vset.pattern.permute.xlu0 %v830_v3 }
   0x2   :  { %v28_v2 = vld [vmem:[%s1108_s1] sm:$0xff]  ;;  %v111_v4 = vsel %vm109_vm0, %v878_v1, 0  ;;  %v43_v6 = vld [vmem:[%s1109_s2 + $0x38] sm:$0xff]  ;;  %71 = vperm.xlu1 %800, %v41_v0   ;;  %v107_v9 = vsel %vm84_vm1, %v35_v5, 0  ;;  %v29_v10 = vld [vmem:[%s1108_s1 + $0x8] sm:$0xff]  ;;  %801 = vset.pattern.permute.xlu2 %v830_v3 }
   0x3   :  { %v128_v7 = vand.u32 4294901760, %v111_v4  ;;  %v86_v8 = vsel %vm84_vm1, %v28_v2, 0  ;;  %81 = vperm.xlu0 %799, %v43_v6   ;;  %v898_v12 = vand.u32 4294901760, %v107_v9  ;;  %v89_v13 = vsel %vm84_vm1, %v29_v10, 0  ;;  %v30_v14 = vld [vmem:[%s1108_s1 + $0x10] sm:$0xff] }
   0x4   :  { %v896_v11 = vand.u32 4294901760, %v86_v8  ;;  %v904_v16 = vand.u32 4294901760, %v89_v13 }
   0x5   :  { %129 = vmatpush.msra.mxu0 %v128_v7  ;;  %795 = vmatpush.msra.mxu2 %v128_v7  ;;  %v211_v15 = vsub.f32 %v111_v4, %v128_v7 }
   0x6   :  { %12 = vsyncpa [#allocation3], 0  ;;  %v131_v17 = vsub.f32 %v86_v8, %v896_v11  ;;  %v908_v18 = vsub.f32 %v107_v9, %v898_v12  ;;  %v139_v20 = vsub.f32 %v89_v13, %v904_v16  ;;  %v92_v21 = vsel %vm84_vm1, %v30_v14, 0  ;;  %v40_v24 = vld [vmem:[%s1109_s2 + $0x20] sm:$0xff]  ;;  %v42_v25 = vld [vmem:[%s1109_s2 + $0x30] sm:$0xff]  ;;  %s786_s13 = sshll.u32 %s1114_s7, 4  ;;  %s787_s13 = int_to_ptr.hbm [resolvable:$true] %s786_s13 }
   0x7   :  { %v212_v19 = vand.u32 4294901760, %v211_v15  ;;  %266 = vmatpush.msrb.mxu2 %v211_v15  ;;  %v922_v30 = vand.u32 4294901760, %v92_v21  ;;  %v31_v34 = vld [vmem:[%s1108_s1 + $0x18] sm:$0xff]  ;;  %v36_v38 = vld [vmem:[%s1109_s2] sm:$0xff]  ;;  %v37_v39 = vld [vmem:[%s1109_s2 + $0x8] sm:$0xff]  ;;  %vm499_vm2 = vcmask 523264  }
   0x8   :  { %v132_v22 = vand.u32 4294901760, %v131_v17  ;;  %v188_v23 = vand.u32 4294901760, %v908_v18  ;;  %v140_v29 = vand.u32 4294901760, %v139_v20  ;;  %v95_v37 = vsel %vm84_vm1, %v31_v34, 0  ;;  %v32_v43 = vld [vmem:[%s1108_s1 + $0x20] sm:$0xff]  ;;  %v39_v47 = vld [vmem:[%s1109_s2 + $0x18] sm:$0xff] }
   0x9   :  { %v213_v26 = vsub.f32 %v211_v15, %v212_v19  ;;  %392 = vmatpush.msrb.mxu0 %v212_v19  ;;  %v147_v36 = vsub.f32 %v92_v21, %v922_v30  ;;  %v937_v42 = vand.u32 4294901760, %v95_v37  ;;  %v98_v46 = vsel %vm84_vm1, %v32_v43, 0  ;;  %61 = vperm.xlu2 %801, %v39_v47   ;;  %v33_v51 = vld [vmem:[%s1108_s1 + $0x28] sm:$0xff]  ;;  %v38_v55 = vld [vmem:[%s1109_s2 + $0x10] sm:$0xff]  ;;  %v748_v9 = vld [vmem:[%s1112_s5] sm:$0xf] }
   0xa   :  { %v133_v27 = vsub.f32 %v131_v17, %v132_v22  ;;  %v189_v28 = vsub.f32 %v908_v18, %v188_v23  ;;  %66 = vperm.xlu1 %800, %v40_v24   ;;  %v141_v35 = vsub.f32 %v139_v20, %v140_v29  ;;  %v162_v50 = vand.u32 4294901760, %v98_v46  ;;  %v34_v59 = vld [vmem:[%s1108_s1 + $0x30] sm:$0xff] }
   0xb   :  { %v214_v31 = vand.u32 4294901760, %v213_v26  ;;  %76 = vperm.xlu0 %799, %v42_v25   ;;  %v148_v41 = vand.u32 4294901760, %v147_v36  ;;  %v155_v45 = vsub.f32 %v95_v37, %v937_v42  ;;  %v101_v54 = vsel %vm84_vm1, %v33_v51, 0 }
   0xc   :  { %v134_v32 = vand.u32 4294901760, %v133_v27  ;;  %v190_v33 = vand.u32 4294901760, %v189_v28  ;;  %v142_v40 = vand.u32 4294901760, %v141_v35  ;;  %v163_v53 = vsub.f32 %v98_v46, %v162_v50 }
   0xd   :  { %215 = vmatpush.msra.mxu1 %v214_v31  ;;  %796 = vmatpush.msra.mxu3 %v214_v31  ;;  %v149_v44 = vsub.f32 %v147_v36, %v148_v41  ;;  %v156_v49 = vand.u32 4294901760, %v155_v45  ;;  %v170_v58 = vand.u32 4294901760, %v101_v54  ;;  %v104_v62 = vsel %vm84_vm1, %v34_v59, 0 }
   0xe   :  { %135 = vmatmul.f32.vlgmr.msra.gmra.mxu0 %v134_v32  ;;  %191 = vmatmul.f32.vlgmr.msra.gmra.mxu2 %v190_v33  ;;  %v164_v57 = vand.u32 4294901760, %v163_v53  ;;  %v178_v2 = vand.u32 4294901760, %v104_v62  ;;  %vm756_vm3 = vcmask 1043456   ;;  %vm774_vm4 = vcmask 1044480  }
   0xf   :  { %217 = vmatmul.f32.vlgmr.msra.gmra.mxu1 %v896_v11  ;;  %245 = vmatmul.f32.vlgmr.msra.gmra.mxu3 %v898_v12  ;;  %v150_v48 = vand.u32 4294901760, %v149_v44  ;;  %v157_v52 = vsub.f32 %v155_v45, %v156_v49  ;;  %v171_v61 = vsub.f32 %v101_v54, %v170_v58  ;;  %vm776_vm5 = vcmask 1045504  }
  0x10   :  { %324 = vmatpush.msrb.mxu3 %v128_v7  ;;  %442 = vmatpush.msrb.mxu1 %v128_v7  ;;  %v165_v60 = vsub.f32 %v163_v53, %v164_v57  ;;  %v179_v4 = vsub.f32 %v104_v62, %v178_v2 }
  0x11   :  { %56 = vperm.xlu2 %801, %v38_v55   ;;  %v158_v56 = vand.u32 4294901760, %v157_v52  ;;  %v172_v0 = vand.u32 4294901760, %v171_v61 }
  0x12   :  { %46 = vperm.xlu1 %800, %v36_v38   ;;  %v166_v63 = vand.u32 4294901760, %v165_v60  ;;  %v180_v6 = vand.u32 4294901760, %v179_v4 }
  0x13   :  { %51 = vperm.xlu0 %799, %v37_v39   ;;  %v173_v3 = vsub.f32 %v171_v61, %v172_v0 }
  0x14   :  { %v181_v7 = vsub.f32 %v179_v4, %v180_v6 }
  0x15   :  { %v174_v5 = vand.u32 4294901760, %v173_v3 }
  0x16   :  { %143 = vmatmul.f32.gmra.mxu0 %v142_v40  ;;  %269 = vmatmul.f32.vlgmr.msrb.gmra.mxu2 %v131_v17  ;;  %v182_v8 = vand.u32 4294901760, %v181_v7 }
  0x17   :  { %221 = vmatmul.f32.gmra.mxu1 %v904_v16  ;;  %328 = vmatmul.f32.vlgmr.msrb.gmra.mxu3 %v132_v22 }
  0x1b   :  { %751 = vperm.xlu0 %799, %v748_v9  }
  0x1e   :  { %151 = vmatmul.f32.gmra.mxu0 %v150_v48  ;;  %274 = vmatmul.f32.gmra.mxu2 %v139_v20 }
  0x1f   :  { %225 = vmatmul.f32.gmra.mxu1 %v922_v30  ;;  %334 = vmatmul.f32.gmra.mxu3 %v140_v29 }
  0x26   :  { %159 = vmatmul.f32.gmra.mxu0 %v158_v56  ;;  %279 = vmatmul.f32.gmra.mxu2 %v147_v36 }
  0x27   :  { %229 = vmatmul.f32.gmra.mxu1 %v937_v42  ;;  %340 = vmatmul.f32.gmra.mxu3 %v148_v41 }
  0x2e   :  { %167 = vmatmul.f32.gmra.mxu0 %v166_v63  ;;  %284 = vmatmul.f32.gmra.mxu2 %v155_v45 }
  0x2f   :  { %233 = vmatmul.f32.gmra.mxu1 %v162_v50  ;;  %346 = vmatmul.f32.gmra.mxu3 %v156_v49 }
  0x36   :  { %175 = vmatmul.f32.gmra.mxu0 %v174_v5  ;;  %289 = vmatmul.f32.gmra.mxu2 %v163_v53 }
  0x37   :  { %237 = vmatmul.f32.gmra.mxu1 %v170_v58  ;;  %352 = vmatmul.f32.gmra.mxu3 %v164_v57 }
  0x3e   :  { %183 = vmatmul.f32.gmra.mxu0 %v182_v8  ;;  %294 = vmatmul.f32.gmra.mxu2 %v171_v61 }
  0x3f   :  { %241 = vmatmul.f32.gmra.mxu1 %v178_v2  ;;  %358 = vmatmul.f32.gmra.mxu3 %v172_v0 }
  0x46   :  { %299 = vmatmul.f32.gmra.mxu2 %v179_v4  ;;  %394 = vmatmul.f32.vlgmr.msrb.gmra.mxu0 %v896_v11 }
  0x47   :  { %364 = vmatmul.f32.gmra.mxu3 %v180_v6  ;;  %444 = vmatmul.f32.vlgmr.msrb.gmra.mxu1 %v896_v11  ;;  %v493_v11 = vld [vmem:[%s1111_s4] sm:$0xf] }
  0x48   :  { %496 = vperm.xlu2 %801, %v493_v11  }
  0x4e   :  { %304 = vmatmul.f32.gmra.mxu2 %v908_v18  ;;  %398 = vmatmul.f32.gmra.mxu0 %v904_v16 }
  0x4f   :  { %370 = vmatmul.f32.gmra.mxu3 %v188_v23  ;;  %448 = vmatmul.f32.gmra.mxu1 %v904_v16 }
  0x56   :  { %402 = vmatmul.f32.gmra.mxu0 %v922_v30 }
  0x57   :  { %452 = vmatmul.f32.gmra.mxu1 %v922_v30 }
  0x5e   :  { %406 = vmatmul.f32.gmra.mxu0 %v937_v42 }
  0x5f   :  { %456 = vmatmul.f32.gmra.mxu1 %v937_v42 }
  0x63   :  { %v62_v21 = vpop.permute.xlu2 %61 }
  0x66   :  { %410 = vmatmul.f32.gmra.mxu0 %v162_v50 }
  0x67   :  { %460 = vmatmul.f32.gmra.mxu1 %v162_v50 }
  0x6b   :  { %v57_v30 = vpop.permute.xlu2 %56 }
  0x6e   :  { %414 = vmatmul.f32.gmra.mxu0 %v170_v58 }
  0x6f   :  { %464 = vmatmul.f32.gmra.mxu1 %v170_v58 }
  0x74   :  { %v72_v10 = vpop.permute.xlu1 %71 }
  0x75   :  { %v978_v13 = vpop.permute.xlu0 %81 }
  0x76   :  { %418 = vmatmul.f32.gmra.mxu0 %v178_v2 }
  0x77   :  { %468 = vmatmul.f32.gmra.mxu1 %v178_v2 }
  0x7c   :  { %v67_v14 = vpop.permute.xlu1 %66 }
  0x7d   :  { %v77_v15 = vpop.permute.xlu0 %76 }
  0x7e   :  { %422 = vmatmul.f32.gmra.mxu0 %v898_v12 }
  0x7f   :  { %472 = vmatmul.f32.gmra.mxu1 %v898_v12 }
  0x84   :  { %v47_v16 = vpop.permute.xlu1 %46 }
  0x85   :  { %v52_v23 = vpop.permute.xlu0 %51 }
  0x8b   :  { %v136_v17 = vpop.f32.mrf.mxu0 }
  0x8c   :  { %v137_v18 = vadd.f32 %v136_v17, %v47_v16  ;;  %v218_v19 = vpop.f32.mrf.mxu1 }
  0x8e   :  { %v219_v20 = vadd.f32 %v218_v19, %v137_v18 }
  0x91   :  { %v982_v22 = vpop.f32.mrf.mxu2 }
  0x92   :  { %v984_v24 = vpop.f32.mrf.mxu3 }
  0x93   :  { %v144_v25 = vpop.f32.mrf.mxu0 }
  0x94   :  { %v145_v26 = vadd.f32 %v144_v25, %v52_v23  ;;  %v222_v27 = vpop.f32.mrf.mxu1 }
  0x96   :  { %v223_v28 = vadd.f32 %v222_v27, %v145_v26  ;;  %v193_v27 = vadd.f32 %v982_v22, %v978_v13 }
  0x99   :  { %v270_v29 = vpop.f32.mrf.mxu2 }
  0x9a   :  { %v271_v12 = vadd.f32 %v270_v29, %v219_v20  ;;  %v329_v31 = vpop.f32.mrf.mxu3 }
  0x9b   :  { %v152_v32 = vpop.f32.mrf.mxu0 }
  0x9c   :  { %v153_v33 = vadd.f32 %v152_v32, %v57_v30  ;;  %v330_v34 = vadd.f32 %v329_v31, %v271_v12  ;;  %v226_v35 = vpop.f32.mrf.mxu1 }
  0x9e   :  { %v227_v36 = vadd.f32 %v226_v35, %v153_v33 }
  0xa1   :  { %v275_v49 = vpop.f32.mrf.mxu2 }
  0xa2   :  { %v335_v50 = vpop.f32.mrf.mxu3  ;;  %v276_v12 = vadd.f32 %v275_v49, %v223_v28 }
  0xa3   :  { %v160_v37 = vpop.f32.mrf.mxu0 }
  0xa4   :  { %v161_v38 = vadd.f32 %v160_v37, %v62_v21  ;;  %v230_v39 = vpop.f32.mrf.mxu1  ;;  %v247_v37 = vadd.f32 %v984_v24, %v193_v27  ;;  %v492_v24 = vld [vmem:[%s1110_s3] sm:$0xf]  ;;  %s831_s3 = smov [#allocation2]  }
  0xa5   :  { %s784_s10 = sshll.u32 %s831_s3, 4  ;;  %s785_s10 = int_to_ptr.vmem [resolvable:$true] %s784_s10 }
  0xa6   :  { %v231_v40 = vadd.f32 %v230_v39, %v161_v38 }
  0xa9   :  { %v280_v53 = vpop.f32.mrf.mxu2 }
  0xaa   :  { %v341_v57 = vpop.f32.mrf.mxu3  ;;  %v281_v26 = vadd.f32 %v280_v53, %v227_v36  ;;  %v336_v36 = vadd.f32 %v335_v50, %v276_v12 }
  0xab   :  { %v168_v41 = vpop.f32.mrf.mxu0 }
  0xac   :  { %v169_v42 = vadd.f32 %v168_v41, %v67_v14  ;;  %v234_v43 = vpop.f32.mrf.mxu1  ;;  %v342_v33 = vadd.f32 %v341_v57, %v281_v26 }
  0xae   :  { %v235_v44 = vadd.f32 %v234_v43, %v169_v42 }
  0xb1   :  { %v285_v59 = vpop.f32.mrf.mxu2 }
  0xb2   :  { %v347_v62 = vpop.f32.mrf.mxu3  ;;  %v286_v21 = vadd.f32 %v285_v59, %v231_v40 }
  0xb3   :  { %v176_v45 = vpop.f32.mrf.mxu0 }
  0xb4   :  { %v177_v46 = vadd.f32 %v176_v45, %v72_v10  ;;  %v238_v47 = vpop.f32.mrf.mxu1  ;;  %v348_v31 = vadd.f32 %v347_v62, %v286_v21 }
  0xb6   :  { %v239_v48 = vadd.f32 %v238_v47, %v177_v46 }
  0xb9   :  { %v290_v2 = vpop.f32.mrf.mxu2 }
  0xba   :  { %v353_v3 = vpop.f32.mrf.mxu3  ;;  %v291_v17 = vadd.f32 %v290_v2, %v235_v44 }
  0xbb   :  { %v184_v51 = vpop.f32.mrf.mxu0 }
  0xbc   :  { %v242_v52 = vpop.f32.mrf.mxu1  ;;  %v185_v10 = vadd.f32 %v184_v51, %v77_v15  ;;  %v354_v29 = vadd.f32 %v353_v3, %v291_v17 }
  0xbe   :  { %v243_v18 = vadd.f32 %v242_v52, %v185_v10 }
  0xc1   :  { %v295_v6 = vpop.f32.mrf.mxu2 }
  0xc2   :  { %v359_v7 = vpop.f32.mrf.mxu3  ;;  %v296_v14 = vadd.f32 %v295_v6, %v239_v48 }
  0xc3   :  { %v395_v54 = vpop.f32.mrf.mxu0 }
  0xc4   :  { %v396_v55 = vadd.f32 %v395_v54, %v330_v34  ;;  %v445_v56 = vpop.f32.mrf.mxu1  ;;  %v360_v23 = vadd.f32 %v359_v7, %v296_v14 }
  0xc6   :  { %v986_v58 = vadd.f32 %v445_v56, %v396_v55 }
  0xc8   :  { %v476_v6 = vmul.f32 0.01, %v986_v58 }
  0xc9   :  { %v300_v11 = vpop.f32.mrf.mxu2 }
  0xca   :  { %v365_v20 = vpop.f32.mrf.mxu3  ;;  %v301_v25 = vadd.f32 %v300_v11, %v243_v18  ;;  %v484_v18 = vmax.f32 %v986_v58, %v476_v6 }
  0xcb   :  { %v399_v60 = vpop.f32.mrf.mxu0 }
  0xcc   :  { %v449_v61 = vpop.f32.mrf.mxu1  ;;  %v366_v32 = vadd.f32 %v365_v20, %v301_v25  ;;  %v400_v45 = vadd.f32 %v399_v60, %v336_v36 }
  0xce   :  { %v450_v54 = vadd.f32 %v449_v61, %v400_v45 }
  0xd0   :  { %v477_v2 = vmul.f32 0.01, %v450_v54 }
  0xd1   :  { %v305_v34 = vpop.f32.mrf.mxu2 }
  0xd2   :  { %v306_v43 = vadd.f32 %v305_v34, %v247_v37  ;;  %v371_v22 = vpop.f32.mrf.mxu3  ;;  %v485_v11 = vmax.f32 %v450_v54, %v477_v2 }
  0xd3   :  { %v403_v63 = vpop.f32.mrf.mxu0 }
  0xd4   :  { %v453_v0 = vpop.f32.mrf.mxu1  ;;  %v404_v42 = vadd.f32 %v403_v63, %v342_v33  ;;  %v372_v49 = vadd.f32 %v371_v22, %v306_v43  ;;  %v1027_v26 = vand.u32 4294901760, %v485_v11 }
  0xd6   :  { %v454_v48 = vadd.f32 %v453_v0, %v404_v42  ;;  %v501_v0 = vsel %vm499_vm2, %v492_v24, 0  ;;  %v1048_v34 = vsub.f32 %v485_v11, %v1027_v26 }
  0xd7   :  { %v999_v7 = vand.u32 4294901760, %v501_v0 }
  0xd8   :  { %v478_v59 = vmul.f32 0.01, %v454_v48 }
  0xda   :  { %v486_v61 = vmax.f32 %v454_v48, %v478_v59 }
  0xdb   :  { %v407_v4 = vpop.f32.mrf.mxu0 }
  0xdc   :  { %v457_v5 = vpop.f32.mrf.mxu1  ;;  %v408_v38 = vadd.f32 %v407_v4, %v348_v31  ;;  %v1017_v20 = vand.u32 4294901760, %v486_v61 }
  0xde   :  { %v458_v28 = vadd.f32 %v457_v5, %v408_v38  ;;  %v1039_v31 = vsub.f32 %v486_v61, %v1017_v20 }
  0xe0   :  { %v479_v50 = vmul.f32 0.01, %v458_v28  ;;  %v576_v36 = vand.u32 4294901760, %v1039_v31 }
  0xe2   :  { %v487_v3 = vmax.f32 %v458_v28, %v479_v50  ;;  %v577_v28 = vsub.f32 %v1039_v31, %v576_v36 }
  0xe3   :  { %v411_v8 = vpop.f32.mrf.mxu0 }
  0xe4   :  { %v461_v9 = vpop.f32.mrf.mxu1  ;;  %v412_v15 = vadd.f32 %v411_v8, %v354_v29  ;;  %v1006_v14 = vand.u32 4294901760, %v487_v3 }
  0xe6   :  { %v462_v44 = vadd.f32 %v461_v9, %v412_v15  ;;  %v1030_v27 = vsub.f32 %v487_v3, %v1006_v14 }
  0xe8   :  { %v480_v51 = vmul.f32 0.01, %v462_v44  ;;  %v570_v38 = vand.u32 4294901760, %v1030_v27 }
  0xea   :  { %v488_v60 = vmax.f32 %v462_v44, %v480_v51  ;;  %v571_v44 = vsub.f32 %v1030_v27, %v570_v38 }
  0xeb   :  { %v415_v16 = vpop.f32.mrf.mxu0 }
  0xec   :  { %v465_v19 = vpop.f32.mrf.mxu1  ;;  %v416_v30 = vadd.f32 %v415_v16, %v360_v23  ;;  %v1001_v8 = vand.u32 4294901760, %v488_v60 }
  0xee   :  { %v466_v39 = vadd.f32 %v465_v19, %v416_v30  ;;  %v1015_v19 = vsub.f32 %v501_v0, %v999_v7  ;;  %v1020_v21 = vsub.f32 %v488_v60, %v1001_v8  ;;  %v1035_v30 = vand.u32 4294901760, %v484_v18 }
  0xf0   :  { %v481_v46 = vmul.f32 0.01, %v466_v39  ;;  %v529_v12 = vand.u32 4294901760, %v1015_v19  ;;  %v564_v33 = vand.u32 4294901760, %v1020_v21 }
  0xf2   :  { %v489_v55 = vmax.f32 %v466_v39, %v481_v46  ;;  %v530_v39 = vsub.f32 %v1015_v19, %v529_v12  ;;  %v565_v42 = vsub.f32 %v1020_v21, %v564_v33 }
  0xf3   :  { %v419_v35 = vpop.f32.mrf.mxu0 }
  0xf4   :  { %v420_v40 = vadd.f32 %v419_v35, %v366_v32  ;;  %v469_v41 = vpop.f32.mrf.mxu1  ;;  %v996_v4 = vand.u32 4294901760, %v489_v55  ;;  %v531_v22 = vand.u32 4294901760, %v530_v39  ;;  %v566_v45 = vand.u32 4294901760, %v565_v42 }
  0xf6   :  { %v470_v13 = vadd.f32 %v469_v41, %v420_v40  ;;  %v1009_v16 = vsub.f32 %v489_v55, %v996_v4  ;;  %v587_v40 = vsub.f32 %v484_v18, %v1035_v30  ;;  %v497_v55 = vpop.permute.xlu2 %496 }
  0xf8   :  { %v482_v47 = vmul.f32 0.01, %v470_v13  ;;  %v558_v29 = vand.u32 4294901760, %v1009_v16  ;;  %v588_v46 = vand.u32 4294901760, %v587_v40 }
  0xfa   :  { %v490_v52 = vmax.f32 %v470_v13, %v482_v47  ;;  %v559_v37 = vsub.f32 %v1009_v16, %v558_v29  ;;  %v582_v13 = vand.u32 4294901760, %v1048_v34  ;;  %v572_v47 = vand.u32 4294901760, %v571_v44 }
  0xfb   :  { %v423_v53 = vpop.f32.mrf.mxu0  ;;  %v589_v51 = vsub.f32 %v587_v40, %v588_v46 }
  0xfc   :  { %v424_v56 = vadd.f32 %v423_v53, %v372_v49  ;;  %v473_v57 = vpop.f32.mrf.mxu1  ;;  %v994_v62 = vand.u32 4294901760, %v490_v52  ;;  %v560_v43 = vand.u32 4294901760, %v559_v37  ;;  %v583_v48 = vsub.f32 %v1048_v34, %v582_v13 }
  0xfd   :  { %v578_v49 = vand.u32 4294901760, %v577_v28  ;;  %v590_v53 = vand.u32 4294901760, %v589_v51 }
  0xfe   :  { %v474_v63 = vadd.f32 %v473_v57, %v424_v56  ;;  %v1004_v9 = vsub.f32 %v490_v52, %v994_v62  ;;  %v584_v52 = vand.u32 4294901760, %v583_v48 }
 0x100   :  { %v483_v5 = vmul.f32 0.01, %v474_v63  ;;  %v552_v25 = vand.u32 4294901760, %v1004_v9 }
 0x102   :  { %v491_v10 = vmax.f32 %v474_v63, %v483_v5  ;;  %v553_v15 = vsub.f32 %v1004_v9, %v552_v25 }
 0x104   :  { %v1011_v17 = vand.u32 4294901760, %v491_v10  ;;  %v554_v41 = vand.u32 4294901760, %v553_v15 }
 0x106   :  { %v1023_v23 = vsub.f32 %v491_v10, %v1011_v17  ;;  %512 = vmatpush.msra.mxu2 %v1011_v17 }
 0x108   :  { %v546_v58 = vand.u32 4294901760, %v1023_v23  ;;  %514 = vmatpush.msra.mxu2 %v994_v62 }
 0x10a   :  { %516 = vmatpush.msra.mxu2 %v996_v4  ;;  %v547_v32 = vsub.f32 %v1023_v23, %v546_v58 }
 0x10c   :  { %518 = vmatpush.msra.mxu2 %v1001_v8  ;;  %v548_v35 = vand.u32 4294901760, %v547_v32 }
 0x10e   :  { %520 = vmatpush.msra.mxu2 %v1006_v14  ;;  %549 = vmatpush.msra.mxu3 %v548_v35 }
 0x110   :  { %522 = vmatpush.msra.mxu2 %v1017_v20  ;;  %555 = vmatpush.msra.mxu3 %v554_v41 }
 0x112   :  { %524 = vmatpush.msra.mxu2 %v1027_v26  ;;  %561 = vmatpush.msra.mxu3 %v560_v43 }
 0x114   :  { %526 = vmatpush.msra.mxu2 %v1035_v30  ;;  %567 = vmatpush.msra.mxu3 %v566_v45 }
 0x115   :  { %532 = vmatmul.f32.vlgmr.msra.gmra.mxu2 %v531_v22 }
 0x116   :  { %607 = vmatpush.msrb.mxu2 %v1023_v23  ;;  %573 = vmatpush.msra.mxu3 %v572_v47 }
 0x118   :  { %610 = vmatpush.msrb.mxu2 %v1004_v9  ;;  %579 = vmatpush.msra.mxu3 %v578_v49  ;;  %v752_v9 = vpop.permute.xlu0 %751 }
 0x11a   :  { %613 = vmatpush.msrb.mxu2 %v1009_v16  ;;  %585 = vmatpush.msra.mxu3 %v584_v52 }
 0x11c   :  { %616 = vmatpush.msrb.mxu2 %v1020_v21  ;;  %591 = vmatpush.msra.mxu3 %v590_v53 }
 0x11d   :  { %593 = vmatmul.f32.vlgmr.msra.gmra.mxu3 %v999_v7 }
 0x11e   :  { %619 = vmatpush.msrb.mxu2 %v1030_v27  ;;  %644 = vmatpush.msrb.mxu3 %v1011_v17 }
 0x120   :  { %622 = vmatpush.msrb.mxu2 %v1039_v31  ;;  %646 = vmatpush.msrb.mxu3 %v994_v62 }
 0x122   :  { %625 = vmatpush.msrb.mxu2 %v1048_v34  ;;  %648 = vmatpush.msrb.mxu3 %v996_v4 }
 0x124   :  { %628 = vmatpush.msrb.mxu2 %v587_v40  ;;  %650 = vmatpush.msrb.mxu3 %v1001_v8 }
 0x125   :  { %631 = vmatmul.f32.vlgmr.msrb.gmra.mxu2 %v1015_v19 }
 0x126   :  { %677 = vmatpush.msra.mxu2 %v546_v58  ;;  %652 = vmatpush.msrb.mxu3 %v1006_v14 }
 0x128   :  { %681 = vmatpush.msra.mxu2 %v552_v25  ;;  %654 = vmatpush.msrb.mxu3 %v1017_v20 }
 0x12a   :  { %685 = vmatpush.msra.mxu2 %v558_v29  ;;  %656 = vmatpush.msrb.mxu3 %v1027_v26 }
 0x12c   :  { %689 = vmatpush.msra.mxu2 %v564_v33  ;;  %658 = vmatpush.msrb.mxu3 %v1035_v30 }
 0x12d   :  { %662 = vmatmul.f32.vlgmr.msrb.gmra.mxu3 %v529_v12 }
 0x12e   :  { %693 = vmatpush.msra.mxu2 %v570_v38  ;;  %720 = vmatpush.msra.mxu3 %v1011_v17 }
 0x130   :  { %697 = vmatpush.msra.mxu2 %v576_v36  ;;  %722 = vmatpush.msra.mxu3 %v994_v62 }
 0x132   :  { %701 = vmatpush.msra.mxu2 %v582_v13  ;;  %724 = vmatpush.msra.mxu3 %v996_v4 }
 0x134   :  { %705 = vmatpush.msra.mxu2 %v588_v46  ;;  %726 = vmatpush.msra.mxu3 %v1001_v8 }
 0x135   :  { %707 = vmatmul.f32.vlgmr.msra.gmra.mxu2 %v999_v7 }
 0x136   :  { %728 = vmatpush.msra.mxu3 %v1006_v14 }
 0x138   :  { %730 = vmatpush.msra.mxu3 %v1017_v20 }
 0x13a   :  { %732 = vmatpush.msra.mxu3 %v1027_v26 }
 0x13c   :  { %734 = vmatpush.msra.mxu3 %v1035_v30 }
 0x13d   :  { %736 = vmatmul.f32.vlgmr.msra.gmra.mxu3 %v999_v7 }
 0x198   :  { %v533_v24 = vpop.f32.mrf.mxu2 }
 0x199   :  { %v534_v56 = vadd.f32 %v533_v24, %v497_v55 }
 0x1a0   :  { %v594_v54 = vpop.f32.mrf.mxu3 }
 0x1a1   :  { %v595_v59 = vadd.f32 %v594_v54, %v534_v56 }
 0x1a8   :  { %v632_v50 = vpop.f32.mrf.mxu2 }
 0x1a9   :  { %v633_v60 = vadd.f32 %v632_v50, %v595_v59 }
 0x1b0   :  { %v663_v57 = vpop.f32.mrf.mxu3 }
 0x1b1   :  { %v664_v63 = vadd.f32 %v663_v57, %v633_v60 }
 0x1b8   :  { %v708_v62 = vpop.f32.mrf.mxu2 }
 0x1b9   :  { %v709_v0 = vadd.f32 %v708_v62, %v664_v63 }
 0x1c0   :  { %v737_v2 = vpop.f32.mrf.mxu3 }
 0x1c1   :  { %v738_v3 = vadd.f32 %v737_v2, %v709_v0 }
 0x1c3   :  { %v740_v4 = vmul.f32 1.442695, %v738_v3  ;;  %v766_v8 = vsel %vm109_vm0, %v738_v3, 0.0 }
 0x1c4   :  { %v767_v11 = vrot.slane %v766_v8, 4 }
 0x1c5   :  { %802 = vpow2.f32 %v740_v4 }
 0x1c6   :  { %v768_v17 = vadd.f32 %v767_v11, %v766_v8 }
 0x1c8   :  { %v769_v21 = vrot.slane %v768_v17, 2 }
 0x1ca   :  { %v770_v26 = vadd.f32 %v769_v21, %v768_v17 }
 0x1cb   :  { %v803_v5 = vpop.eup %802 }
 0x1cc   :  { %v743_v6 = vrot.slane %v803_v5, 6  ;;  %v771_v29 = vrot.slane %v770_v26, 1 }
 0x1ce   :  { %v745_v61 = vmul.f32 %v743_v6, %v878_v1 }
 0x1d0   :  { %v746_v7 = vadd.f32 %v745_v61, %v738_v3 }
 0x1d2   :  { %v747_v10 = vsel %vm109_vm0, %v878_v1, %v746_v7  ;;  %v772_v1 = vadd.f32 %v771_v29, %v770_v26 }
 0x1d3   :  { %v754_v14 = vsub.f32 %v747_v10, %v752_v9 }
 0x1d5   :  { %v755_v16 = vmul.f32 %v754_v14, %v754_v14 }
 0x1d7   :  { %v757_v18 = vsel %vm756_vm3, %v755_v16, 0.0 }
 0x1d8   :  { %v758_v19 = vrot.slane %v757_v18, 4 }
 0x1da   :  { %v759_v20 = vadd.f32 %v758_v19, %v757_v18 }
 0x1dc   :  { %v760_v23 = vrot.slane %v759_v20, 2 }
 0x1de   :  { %v761_v25 = vadd.f32 %v760_v23, %v759_v20 }
 0x1e0   :  { %v762_v27 = vrot.slane %v761_v25, 1 }
 0x1e2   :  { %v763_v58 = vadd.f32 %v762_v27, %v761_v25 }
 0x1e4   :  { %v764_v30 = vmul.f32 -0.5, %v763_v58 }
 0x1e6   :  { %v765_v12 = vadd.f32 -3.675754, %v764_v30 }
 0x1e8   :  { %v773_v31 = vsel %vm756_vm3, %v747_v10, %v765_v12 }
 0x1e9   :  { %v775_v32 = vsel %vm774_vm4, %v773_v31, %v772_v1 }
 0x1ea   :  { %v777_v15 = vsel %vm776_vm5, %v775_v32, 0.0 }
 0x1eb   :  { %778 = vst [vmem:[#allocation2] sm:$0xff] %v777_v15 }
 0x1ec   :  { %789 = dma.vmem_to_hbm [thread:$0]  %s785_s10, 128, %s787_s13, [#allocation3]  }
 0x1ed   :  { %828 = dma.done.wait [#allocation3], 128  }
 0x1ee   :  { %829 = vsyncadd [#allocation3], 4294967168 }
 0x1ef   :  { %794 = vsyncpa [#allocation3], 1 }

</bundles_post_ra>
